<compile_context>
chip_gen: v7x
topology: tpu7x:2x2x1
jax: 0.10.0
libtpu: 0.0.40
codegen_flags: <defaults>
</compile_context>

<pallas_src>
import jax
import jax.numpy as jnp
from jax.experimental import pallas as pl
from jax.experimental.pallas import tpu as pltpu


def _float_kernel(x_ref, o_ref):
    """Elementwise cast of one (tm, C) tile to float32 (single load, single store)."""
    o_ref[...] = x_ref[...].astype(jnp.float32)


def _default_block_rows():
    """Pick a row-tile size based on TPU generation (scoped-VMEM safe)."""
    try:
        kind = jax.devices()[0].device_kind.lower()
    except Exception:
        return 512
    # Older generations (v2-v5) have a 16 MiB default scoped-VMEM limit; cap at
    # 512 rows (<= 8 MiB double-buffered worst case). v6e / v7x get 1024 rows
    # (<= 16 MiB double-buffered worst case, within the 32 MiB default limit).
    for old in ("v2", "v3", "v4", "v5"):
        if old in kind:
            return 512
    return 1024


def to_float_pallas(x: jax.Array, *, block_rows: int | None = None):
    """Cast an arbitrary-shape / arbitrary-dtype array to float32 with a Pallas kernel."""
    x = jnp.asarray(x)

    # Fast path: already float32 -> .float() is a no-op.
    if x.dtype == jnp.float32:
        return x

    orig_shape = x.shape
    total = int(x.size)
    if total == 0:
        return jnp.zeros(orig_shape, dtype=jnp.float32)

    # Booleans are rare and awkward as a VMEM tile dtype; plain astype is fine.
    if x.dtype == jnp.bool_:
        return x.astype(jnp.float32)

    if block_rows is None:
        block_rows = _default_block_rows()

    # Choose a lane-dense row width C that divides the flat size when possible,
    # so no padding copy and no output-trim copy are needed.
    C = None
    for cand in (1024, 512, 256, 128):
        if total % cand == 0:
            C = cand
            break
    if C is None:
        C = 1024
        R = -(-total // C)                  # ceil
        pad = R * C - total
    else:
        R = total // C
        pad = 0

    flat = jnp.ravel(x)                     # view/reshape, no copy for contiguous input
    if pad:
        flat = jnp.pad(flat, (0, pad))      # only copies when flat size % 128 != 0
    x2 = flat.reshape(R, C)

    # Row tile: big blocks amortize grid-step overhead; clamp to full extent for
    # small inputs. If the whole thing would be one block but is reasonably
    # large, split into 2 so the "parallel" axis can shard across 2 TensorCores.
    tm = min(block_rows, R)
    if tm == R and R >= 64:
        half = -(-R // 2)
        tm = min(-(-half // 32) * 32, R)    # multiple of 32 (covers 8/16/32 sublane packing)
    n_blocks = pl.cdiv(R, tm)

    in_bytes = R * C * x2.dtype.itemsize
    out_bytes = R * C * 4
    cost = pl.CostEstimate(flops=0, transcendentals=0,
                           bytes_accessed=in_bytes + out_bytes)

    out2 = pl.pallas_call(
        _float_kernel,
        out_shape=jax.ShapeDtypeStruct((R, C), jnp.float32),
        grid=(n_blocks,),
        in_specs=[pl.BlockSpec((tm, C), lambda i: (i, 0))],
        out_specs=pl.BlockSpec((tm, C), lambda i: (i, 0)),
        compiler_params=pltpu.CompilerParams(
            dimension_semantics=("parallel",),
        ),
        cost_estimate=cost,
    )(x2)

    if pad:
        out = out2.reshape(-1)[:total].reshape(orig_shape)
    else:
        out = out2.reshape(orig_shape)
    return out


class FloatPallas:
    """JAX/Pallas counterpart of the PyTorch `Float` module."""

    def __call__(self, in_tensor, **kwargs):
        return to_float_pallas(in_tensor)


if __name__ == "__main__":
    key = jax.random.PRNGKey(0)
    module = FloatPallas()

    k1, k2, k3, k4 = jax.random.split(key, 4)

    # Test 1: int32 input, shape (2, 4, 16, 16) -> float32 (aligned, zero-copy wrapper path)
    x_int = jax.random.randint(k1, (2, 4, 16, 16), -100, 100, dtype=jnp.int32)
    out_int = jax.block_until_ready(module(x_int))
    ref_int = x_int.astype(jnp.float32)
    assert out_int.dtype == jnp.float32
    assert out_int.shape == x_int.shape
    assert jnp.array_equal(out_int, ref_int), "int32 -> float32 cast mismatch"

    # Test 2: bfloat16 input with a non-aligned flat size (exercises the pad/trim path)
    x_bf16 = jax.random.normal(k2, (3, 1000), dtype=jnp.bfloat16)
    out_bf16 = jax.block_until_ready(module(x_bf16))
    ref_bf16 = x_bf16.astype(jnp.float32)
    assert out_bf16.dtype == jnp.float32
    assert out_bf16.shape == x_bf16.shape
    assert jnp.array_equal(out_bf16, ref_bf16), "bfloat16 -> float32 cast mismatch"

    # Test 3: bfloat16 input large enough to exercise the 2-block (dual-TC) split path
    x_big = jax.random.normal(k3, (128, 1024), dtype=jnp.bfloat16)
    out_big = jax.block_until_ready(module(x_big))
    ref_big = x_big.astype(jnp.float32)
    assert out_big.dtype == jnp.float32
    assert jnp.array_equal(out_big, ref_big), "bfloat16 (multi-block) -> float32 cast mismatch"

    # Test 4: float32 input -> fast path (no kernel), values unchanged
    x_f32 = jax.random.normal(k4, (2, 8, 32), dtype=jnp.float32)
    out_f32 = jax.block_until_ready(module(x_f32))
    assert out_f32.dtype == jnp.float32
    assert jnp.array_equal(out_f32, x_f32), "float32 fast-path mismatch"

    print("KERNEL_OK")
</pallas_src>

<mosaic_0001>
module attributes {stable_mosaic.version = 11 : i64} {
  func.func @_float_kernel(%arg0: i32, %arg1: memref<2x1024xi32, #tpu.memory_space<vmem>>, %arg2: memref<2x1024xf32, #tpu.memory_space<vmem>>) attributes {dimension_semantics = [#tpu.dimension_semantics<parallel>], iteration_bounds = array<i64: 1>, scalar_prefetch = 0 : i64, scratch_operands = 0 : i64, tpu.core_type = #tpu.core_type<tc>, window_params = [{transform_indices = @transform_0, window_bounds = array<i64: 2, 1024>}, {transform_indices = @transform_1, window_bounds = array<i64: 2, 1024>}]} {
    %c0 = arith.constant 0 : index
    %c0_0 = arith.constant 0 : index
    %0 = vector.load %arg1[%c0, %c0_0] : memref<2x1024xi32, #tpu.memory_space<vmem>>, vector<2x1024xi32>
    %1 = arith.sitofp %0 : vector<2x1024xi32> to vector<2x1024xf32>
    %c0_1 = arith.constant 0 : index
    %c0_2 = arith.constant 0 : index
    %2 = vector.load %arg2[%c0_1, %c0_2] : memref<2x1024xf32, #tpu.memory_space<vmem>>, vector<2x1024xf32>
    tpu.vector_store %arg2[%c0_1, %c0_2], %1 {strides = array<i32>} : memref<2x1024xf32, #tpu.memory_space<vmem>>, vector<2x1024xf32>,
    return
  }
  func.func @transform_0(%arg0: i32) -> (i32, i32) {
    %c0_i32 = arith.constant 0 : i32
    %c0_i32_0 = arith.constant 0 : i32
    return %arg0, %c0_i32 : i32, i32
  }
  func.func @transform_1(%arg0: i32) -> (i32, i32) {
    %c0_i32 = arith.constant 0 : i32
    %c0_i32_0 = arith.constant 0 : i32
    return %arg0, %c0_i32 : i32, i32
  }
}

</mosaic_0001>

<bundles_post_ra>
// kernel: tpu_custom_call.1
= control target key start
LH: loop header
LB: loop body
LE: loop exit
PB: predicated region body
PF: predicated region fallthrough
CT: control target
= control target key end

     0   :  { %6 = vsyncpa [#allocation3], 0  ;;  %s128_s0 = inlined_call_operand.hbm [shape: s32[2,1024], index: 0, kind: input, shape index: {}]   ;;  %s129_s1 = inlined_call_operand.hbm [shape: f32[2,1024], index: 1, kind: output, shape index: {}]  }
   0x1   :  { %7 = vsyncpa [#allocation4], 0  ;;  %s92_s6 = smov [#allocation2]   ;;  %s44_s10 = scalar_lea.hbm %s128_s0, 256 }
   0x2   :  { %s14_s7 = sshll.u32 %s92_s6, 4  ;;  %p45_p0 = scmp.ne.s32.totalorder %s128_s0, %s44_s10  ;;  %s15_s7 = int_to_ptr.vmem [resolvable:$true] %s14_s7 }
   0x3   :  { %p48_p1 = scmp.lt.u32.totalorder %s44_s10, %s128_s0 }
   0x5   :  { %p50_p2 = pnand %p48_p1, %p45_p0 }
   0x7   :  { %53 = shalt.err (!%p50_p2)
}
   0x8   :  { %s54_s15 = scalar_lea.vmem %s15_s7, 256  ;;  %p59_p4 = scmp.lt.s32.totalorder %s15_s7, %s15_s7 }
   0x9   :  { %p55_p3 = scmp.ne.s32.totalorder %s15_s7, %s54_s15  ;;  %p60_p5 = scmp.lt.s32.totalorder %s54_s15, %s54_s15 }
   0xb   :  { %p61_p6 = por %p60_p5, %p59_p4 }
   0xd   :  { %p62_p7 = pnand %p61_p6, %p55_p3 }
   0xf   :  { %65 = shalt.err (!%p62_p7)
}
  0x10   :  { %17 = dma.hbm_to_vmem [thread:$0]  %s128_s0, 256, %s15_s7, [#allocation3]  }
  0x11   :  { %88 = dma.done.wait [#allocation3], 256  }
  0x12   :  { %89 = vsyncadd [#allocation3], 4294967040  ;;  %s93_s18 = smov [#allocation5]   ;;  %v21_v0 = vld [vmem:[#allocation2] sm:$0xff]  ;;  %v22_v1 = vld [vmem:[#allocation2 + $0x8] sm:$0xff] }
  0x13   :  { %s33_s19 = sshll.u32 %s93_s18, 4  ;;  %v23_v2 = vcvt.s32.f32 %v21_v0  ;;  %v24_v3 = vcvt.s32.f32 %v22_v1  ;;  %s34_s19 = int_to_ptr.vmem [resolvable:$true] %s33_s19 }
  0x14   :  { %s66_s20 = scalar_lea.vmem %s34_s19, 256  ;;  %p71_p9 = scmp.lt.s32.totalorder %s34_s19, %s34_s19 }
  0x15   :  { %25 = vst [vmem:[#allocation5] sm:$0xff] %v23_v2  ;;  %26 = vst [vmem:[#allocation5 + $0x8] sm:$0xff] %v24_v3  ;;  %p67_p8 = scmp.ne.s32.totalorder %s34_s19, %s66_s20  ;;  %p72_p10 = scmp.lt.s32.totalorder %s66_s20, %s66_s20 }
  0x17   :  { %p73_p11 = por %p72_p10, %p71_p9 }
  0x19   :  { %p74_p12 = pnand %p73_p11, %p67_p8 }
  0x1b   :  { %77 = shalt.err (!%p74_p12)
}
  0x1c   :  { %s78_s22 = scalar_lea.hbm %s129_s1, 256 }
  0x1d   :  { %p79_p13 = scmp.ne.s32.totalorder %s129_s1, %s78_s22  ;;  %p82_p0 = scmp.lt.u32.totalorder %s78_s22, %s129_s1 }
  0x1f   :  { %p84_p1 = pnand %p82_p0, %p79_p13 }
  0x21   :  { %87 = shalt.err (!%p84_p1)
}
  0x22   :  { %36 = dma.vmem_to_hbm [thread:$0]  %s34_s19, 256, %s129_s1, [#allocation4]  }
  0x23   :  { %90 = dma.done.wait [#allocation4], 256  }
  0x24   :  { %91 = vsyncadd [#allocation4], 4294967040 }
  0x25   :  { %40 = vsyncpa [#allocation3], 1 }
  0x26   :  { %41 = vsyncpa [#allocation4], 1 }

</bundles_post_ra>
